<compile_context>
chip_gen: v7x
topology: tpu7x:2x2x1
jax: 0.10.0
libtpu: 0.0.40
codegen_flags: <defaults>
</compile_context>

<pallas_src>
import functools

import jax
import jax.numpy as jnp
from jax import lax
from jax.experimental import pallas as pl
from jax.experimental.pallas import tpu as pltpu


# ----------------------------------------------------------------------------- 
# Kernel helpers
# -----------------------------------------------------------------------------
def _kernel_sum(l2, scales_ref, *, kernel_mul, kernel_num):
    """sum_t exp(-L2 / bw_t), bw_t = bw0 * kernel_mul**t, scales_ref[t] = -1/bw_t."""
    mul_int = int(round(kernel_mul))
    use_power_chain = (
        abs(kernel_mul - mul_int) < 1e-12
        and mul_int >= 2
        and mul_int ** (kernel_num - 1) <= 256  # keep rounding amplification tiny
    )
    if use_power_chain:
        # Single EUP exp at the *largest* bandwidth; remaining kernels via an
        # integer power chain on the VPU:  exp(-L2/bw_t) = base ** mul**(K-1-t).
        base = jnp.exp(l2 * scales_ref[kernel_num - 1])
        ksum = base
        term = base
        for _ in range(kernel_num - 1):
            nxt = term
            for _ in range(mul_int - 1):
                nxt = nxt * term          # term ** mul_int
            term = nxt
            ksum = ksum + term
        return ksum
    # Generic path: one exp per kernel.
    ksum = jnp.exp(l2 * scales_ref[0])
    for t in range(1, kernel_num):
        ksum = ksum + jnp.exp(l2 * scales_ref[t])
    return ksum


def _tile_epilogue(gram, i_blk, j_blk, rnorm_ref, cnorm_ref, wrow_ref, wcol_ref,
                   scales_ref, o_ref, *, kernel_mul, kernel_num):
    """Turn a Gram tile into a signed, symmetry-weighted partial sum."""
    tm, tn = gram.shape
    rn = rnorm_ref[...]                       # (tm, 1)   row norms
    cn = cnorm_ref[...].reshape(1, tn)        # (1, tn)   col norms (row layout)
    # Squared distances; clamp tiny negative cancellation noise.
    l2 = jnp.maximum(rn + cn - 2.0 * gram, 0.0)
    ksum = _kernel_sum(l2, scales_ref, kernel_mul=kernel_mul, kernel_num=kernel_num)

    # +1 source / -1 target / 0 padded rows -> folds quadrant sign & row padding.
    wr = wrow_ref[...]                        # (tm, 1)
    wc = wcol_ref[...].reshape(1, tn)         # (1, tn)
    # Off-diagonal tile pairs stand for both (i,j) and (j,i) of the symmetric K.
    factor = jnp.where(i_blk == j_blk, jnp.float32(1.0), jnp.float32(2.0))
    partial = factor * jnp.sum(ksum * wr * wc)
    # Lane-dense (8,128) output block filled with this pair's partial sum.
    o_ref[...] = jnp.full((8, 128), partial, dtype=jnp.float32)


def _mmd_pair_kernel_1k(i_idx_ref, j_idx_ref, rows_ref, cols_ref, rnorm_ref,
                        cnorm_ref, wrow_ref, wcol_ref, scales_ref, o_ref,
                        *, kernel_mul, kernel_num):
    """num_k == 1 fast path: no accumulator scratch, no pl.when guards."""
    p = pl.program_id(0)
    gram = lax.dot_general(
        rows_ref[...], cols_ref[...],
        dimension_numbers=(((1,), (1,)), ((), ())),   # rows @ cols^T on the MXU
        preferred_element_type=jnp.float32,
    )
    _tile_epilogue(gram, i_idx_ref[p], j_idx_ref[p], rnorm_ref, cnorm_ref,
                   wrow_ref, wcol_ref, scales_ref, o_ref,
                   kernel_mul=kernel_mul, kernel_num=kernel_num)


def _mmd_pair_kernel(i_idx_ref, j_idx_ref, rows_ref, cols_ref, rnorm_ref,
                     cnorm_ref, wrow_ref, wcol_ref, scales_ref, o_ref, acc_ref,
                     *, kernel_mul, kernel_num):
    """General path: feature axis tiled, f32 accumulation in VMEM scratch."""
    k = pl.program_id(1)

    @pl.when(k == 0)
    def _():
        acc_ref[...] = jnp.zeros_like(acc_ref)

    acc_ref[...] += lax.dot_general(
        rows_ref[...], cols_ref[...],
        dimension_numbers=(((1,), (1,)), ((), ())),
        preferred_element_type=jnp.float32,
    )

    @pl.when(k == pl.num_programs(1) - 1)
    def _():
        p = pl.program_id(0)
        _tile_epilogue(acc_ref[...], i_idx_ref[p], j_idx_ref[p], rnorm_ref,
                       cnorm_ref, wrow_ref, wcol_ref, scales_ref, o_ref,
                       kernel_mul=kernel_mul, kernel_num=kernel_num)


# -----------------------------------------------------------------------------
# Tiling heuristics
# -----------------------------------------------------------------------------
def _round_up(x, m):
    return -(-x // m) * m


def _choose_row_tile(b):
    """Return (tile, padded_rows_per_domain): MXU-friendly tile, modest padding."""
    for t in (512, 256, 128):
        bp = _round_up(b, t)
        if b >= t and bp <= int(b * 1.13) + 8:
            return t, bp
    bp = _round_up(b, 8)
    if bp <= 1024:
        return bp, bp                 # one tile per domain
    bp = _round_up(b, 128)
    return 128, bp


def _choose_feat_tile(dp):
    if dp <= 2048:
        return dp                     # -> num_k == 1 fast path
    for t in (2048, 1024, 512, 256, 128):
        if dp % t == 0:
            return t
    return 128


# -----------------------------------------------------------------------------
# Wrapper
# -----------------------------------------------------------------------------
def mmd_loss(source, target, kernel_mul=2.0, kernel_num=5, prefer_bf16_gram=False):
    """source, target: (B, D) arrays. Returns scalar MMD loss (float32)."""
    assert source.ndim == 2 and source.shape == target.shape
    b, d = source.shape
    n = 2 * b
    kernel_mul = float(kernel_mul)
    kernel_num = int(kernel_num)

    # Keep bf16 inputs in bf16 for the MXU Gram matmul (optionally downcast f32 on
    # v5e via prefer_bf16_gram); everything else runs in f32.
    if source.dtype == jnp.bfloat16 or (prefer_bf16_gram and source.dtype == jnp.float32):
        mm_dtype = jnp.bfloat16
    else:
        mm_dtype = jnp.float32

    tile, bp = _choose_row_tile(b)
    dp = _round_up(max(d, 1), 128)
    tk = _choose_feat_tile(dp)
    num_rc = (2 * bp) // tile
    num_k = dp // tk

    # Zero-pad rows (per domain) and features; zeros change neither norms nor Gram.
    src_p = jnp.pad(source.astype(mm_dtype), ((0, bp - b), (0, dp - d)))
    tgt_p = jnp.pad(target.astype(mm_dtype), ((0, bp - b), (0, dp - d)))
    total = jnp.concatenate([src_p, tgt_p], axis=0)                 # (2*bp, dp)

    w_half = jnp.concatenate([jnp.ones((b,), jnp.float32),
                              jnp.zeros((bp - b,), jnp.float32)])
    weights = jnp.concatenate([w_half, -w_half])                    # (2*bp,)

    # --- Cheap O(N*D) prologue: row norms + closed-form bandwidth ------------
    total_f32 = total.astype(jnp.float32)
    norms = jnp.sum(total_f32 * total_f32, axis=1, keepdims=True)   # (2bp,1), pad rows = 0
    col_sum = jnp.sum(total_f32, axis=0)                            # (dp,)
    # sum_{i,j real} ||x_i - x_j||^2 = 2N*sum_i||x_i||^2 - 2*||sum_i x_i||^2
    sum_l2 = 2.0 * n * jnp.sum(norms) - 2.0 * jnp.dot(col_sum, col_sum)
    bandwidth = sum_l2 / jnp.float32(n * n - n)
    bandwidth = bandwidth / jnp.float32(kernel_mul ** (kernel_num // 2))
    bandwidth = jnp.maximum(bandwidth, jnp.float32(1e-12))          # degenerate-input guard
    scales = (-1.0 / (bandwidth *
                      (kernel_mul ** jnp.arange(kernel_num, dtype=jnp.float32)))
              ).astype(jnp.float32)                                 # (kernel_num,)

    norms_c = norms.reshape(num_rc, 1, tile)     # col norms / weights already row-layout
    w_rows = weights.reshape(2 * bp, 1)
    w_cols = weights.reshape(num_rc, 1, tile)

    # Upper-triangle tile pairs, i-major so the row slab index repeats across
    # consecutive steps (Pallas skips unchanged-index DMAs).
    pairs = [(i, j) for i in range(num_rc) for j in range(i, num_rc)]
    num_pairs = len(pairs)
    i_idx = jnp.asarray([p[0] for p in pairs], dtype=jnp.int32)
    j_idx = jnp.asarray([p[1] for p in pairs], dtype=jnp.int32)

    out_shape = jax.ShapeDtypeStruct((num_pairs * 8, 128), jnp.float32)
    smem_spec = pl.BlockSpec(memory_space=pltpu.MemorySpace.SMEM)

    if num_k == 1:
        kernel = functools.partial(_mmd_pair_kernel_1k,
                                   kernel_mul=kernel_mul, kernel_num=kernel_num)
        grid_spec = pltpu.PrefetchScalarGridSpec(
            num_scalar_prefetch=2,
            grid=(num_pairs,),
            in_specs=[
                pl.BlockSpec((tile, tk), lambda p, ii, jj: (ii[p], 0)),      # row slab
                pl.BlockSpec((tile, tk), lambda p, ii, jj: (jj[p], 0)),      # col slab
                pl.BlockSpec((tile, 1), lambda p, ii, jj: (ii[p], 0)),       # row norms
                pl.BlockSpec((1, 1, tile), lambda p, ii, jj: (jj[p], 0, 0)),  # col norms
                pl.BlockSpec((tile, 1), lambda p, ii, jj: (ii[p], 0)),       # row weights
                pl.BlockSpec((1, 1, tile), lambda p, ii, jj: (jj[p], 0, 0)),  # col weights
                smem_spec,                                                   # scales
            ],
            out_specs=pl.BlockSpec((8, 128), lambda p, ii, jj: (p, 0)),
        )
        dim_sem = ("parallel",)
    else:
        kernel = functools.partial(_mmd_pair_kernel,
                                   kernel_mul=kernel_mul, kernel_num=kernel_num)
        grid_spec = pltpu.PrefetchScalarGridSpec(
            num_scalar_prefetch=2,
            grid=(num_pairs, num_k),
            in_specs=[
                pl.BlockSpec((tile, tk), lambda p, k, ii, jj: (ii[p], k)),
                pl.BlockSpec((tile, tk), lambda p, k, ii, jj: (jj[p], k)),
                pl.BlockSpec((tile, 1), lambda p, k, ii, jj: (ii[p], 0)),
                pl.BlockSpec((1, 1, tile), lambda p, k, ii, jj: (jj[p], 0, 0)),
                pl.BlockSpec((tile, 1), lambda p, k, ii, jj: (ii[p], 0)),
                pl.BlockSpec((1, 1, tile), lambda p, k, ii, jj: (jj[p], 0, 0)),
                smem_spec,
            ],
            out_specs=pl.BlockSpec((8, 128), lambda p, k, ii, jj: (p, 0)),
            scratch_shapes=[pltpu.VMEM((tile, tile), jnp.float32)],
        )
        dim_sem = ("parallel", "arbitrary")

    out = pl.pallas_call(
        kernel,
        out_shape=out_shape,
        grid_spec=grid_spec,
        compiler_params=pltpu.CompilerParams(
            dimension_semantics=dim_sem,
            vmem_limit_bytes=48 * 1024 * 1024,   # safe on v5e/v6e (128 MiB) and v7x (64 MiB)
        ),
    )(i_idx, j_idx, total, total, norms, norms_c, w_rows, w_cols, scales)

    partials = out[::8, 0]                      # one signed partial sum per tile pair
    return jnp.sum(partials) / jnp.float32(b * b)


# -----------------------------------------------------------------------------
# Pure-JAX reference mirroring the PyTorch module
# -----------------------------------------------------------------------------
def _mmd_ref(source, target, kernel_mul=2.0, kernel_num=5):
    b = source.shape[0]
    total = jnp.concatenate([source, target], axis=0).astype(jnp.float32)
    n = total.shape[0]
    diff = total[None, :, :] - total[:, None, :]
    l2 = jnp.sum(diff * diff, axis=2)
    bandwidth = jnp.sum(l2) / (n * n - n)
    bandwidth = bandwidth / (kernel_mul ** (kernel_num // 2))
    kernels = sum(jnp.exp(-l2 / (bandwidth * kernel_mul**i)) for i in range(kernel_num))
    xx = kernels[:b, :b]
    yy = kernels[b:, b:]
    xy = kernels[:b, b:]
    yx = kernels[b:, :b]
    return jnp.mean(xx + yy - xy - yx)


if __name__ == "__main__":
    key = jax.random.PRNGKey(0)
    k1, k2 = jax.random.split(key)
    B, D = 16, 40                                  # exercises multi-tile grid + D padding
    source = jax.random.normal(k1, (B, D), dtype=jnp.float32)
    target = jax.random.normal(k2, (B, D), dtype=jnp.float32) + 0.5

    loss = jax.block_until_ready(mmd_loss(source, target))
    ref = jax.block_until_ready(_mmd_ref(source, target))

    assert jnp.isfinite(loss), "loss is not finite"
    assert jnp.allclose(loss, ref, rtol=1e-3, atol=1e-5), (loss, ref)
    print("KERNEL_OK")
</pallas_src>

<mosaic_0001>
module attributes {stable_mosaic.version = 11 : i64} {
  func.func @_mmd_pair_kernel_1k(%arg0: i32, %arg1: memref<3xi32, #tpu.memory_space<smem>>, %arg2: memref<3xi32, #tpu.memory_space<smem>>, %arg3: memref<16x128xf32, #tpu.memory_space<vmem>>, %arg4: memref<16x128xf32, #tpu.memory_space<vmem>>, %arg5: memref<16x1xf32, #tpu.memory_space<vmem>>, %arg6: memref<1x1x16xf32, #tpu.memory_space<vmem>>, %arg7: memref<16x1xf32, #tpu.memory_space<vmem>>, %arg8: memref<1x1x16xf32, #tpu.memory_space<vmem>>, %arg9: memref<5xf32, #tpu.memory_space<smem>>, %arg10: memref<8x128xf32, #tpu.memory_space<vmem>>) attributes {dimension_semantics = [#tpu.dimension_semantics<parallel>], iteration_bounds = array<i64: 3>, scalar_prefetch = 2 : i64, scratch_operands = 0 : i64, tpu.core_type = #tpu.core_type<tc>, window_params = [{transform_indices = @transform_0, window_bounds = array<i64: 16, 128>}, {transform_indices = @transform_1, window_bounds = array<i64: 16, 128>}, {transform_indices = @transform_2, window_bounds = array<i64: 16, 1>}, {transform_indices = @transform_3, window_bounds = array<i64: 1, 1, 16>}, {transform_indices = @transform_4, window_bounds = array<i64: 16, 1>}, {transform_indices = @transform_5, window_bounds = array<i64: 1, 1, 16>}, {transform_indices = @transform_6, window_bounds = array<i64: 5>}, {transform_indices = @transform_7, window_bounds = array<i64: 8, 128>}]} {
    %c0 = arith.constant 0 : index
    %c0_0 = arith.constant 0 : index
    %0 = vector.load %arg3[%c0, %c0_0] : memref<16x128xf32, #tpu.memory_space<vmem>>, vector<16x128xf32>
    %c0_1 = arith.constant 0 : index
    %c0_2 = arith.constant 0 : index
    %1 = vector.load %arg4[%c0_1, %c0_2] : memref<16x128xf32, #tpu.memory_space<vmem>>, vector<16x128xf32>
    %cst = arith.constant dense<0.000000e+00> : vector<16x16xf32>
    %2 = tpu.matmul %0, %1, %cst {dimension_numbers = #tpu.dot_dimension_numbers<[1], [1], [0], [0], [0, 0, 1, 0], [], []>} : vector<16x128xf32>, vector<16x128xf32>, vector<16x16xf32> -> vector<16x16xf32>
    %3 = arith.index_cast %arg0 : i32 to index
    %4 = memref.load %arg1[%3] : memref<3xi32, #tpu.memory_space<smem>>
    %5 = arith.index_cast %arg0 : i32 to index
    %6 = memref.load %arg2[%5] : memref<3xi32, #tpu.memory_space<smem>>
    %c0_3 = arith.constant 0 : index
    %c0_4 = arith.constant 0 : index
    %7 = vector.load %arg5[%c0_3, %c0_4] : memref<16x1xf32, #tpu.memory_space<vmem>>, vector<16x1xf32>
    %c0_5 = arith.constant 0 : index
    %c0_6 = arith.constant 0 : index
    %c0_7 = arith.constant 0 : index
    %8 = vector.load %arg6[%c0_5, %c0_6, %c0_7] : memref<1x1x16xf32, #tpu.memory_space<vmem>>, vector<1x1x16xf32>
    %9 = vector.shape_cast %8 : vector<1x1x16xf32> to vector<1x16xf32>
    %10 = vector.broadcast %7 : vector<16x1xf32> to vector<16x16xf32>
    %11 = vector.broadcast %9 : vector<1x16xf32> to vector<16x16xf32>
    %12 = arith.addf %10, %11 : vector<16x16xf32>
    %cst_8 = arith.constant 2.000000e+00 : f32
    %13 = vector.broadcast %cst_8 : f32 to vector<16x16xf32>
    %14 = arith.mulf %13, %2 : vector<16x16xf32>
    %15 = arith.subf %12, %14 : vector<16x16xf32>
    %cst_9 = arith.constant 0.000000e+00 : f32
    %16 = vector.broadcast %cst_9 : f32 to vector<16x16xf32>
    %17 = arith.maximumf %15, %16 : vector<16x16xf32>
    %c4 = arith.constant 4 : index
    %18 = memref.load %arg9[%c4] : memref<5xf32, #tpu.memory_space<smem>>
    %19 = vector.broadcast %18 : f32 to vector<16x16xf32>
    %20 = arith.mulf %17, %19 : vector<16x16xf32>
    %21 = math.exp %20 : vector<16x16xf32>
    %22 = arith.mulf %21, %21 : vector<16x16xf32>
    %23 = arith.addf %21, %22 : vector<16x16xf32>
    %24 = arith.mulf %22, %22 : vector<16x16xf32>
    %25 = arith.addf %23, %24 : vector<16x16xf32>
    %26 = arith.mulf %24, %24 : vector<16x16xf32>
    %27 = arith.addf %25, %26 : vector<16x16xf32>
    %28 = arith.mulf %26, %26 : vector<16x16xf32>
    %29 = arith.addf %27, %28 : vector<16x16xf32>
    %c0_10 = arith.constant 0 : index
    %c0_11 = arith.constant 0 : index
    %30 = vector.load %arg7[%c0_10, %c0_11] : memref<16x1xf32, #tpu.memory_space<vmem>>, vector<16x1xf32>
    %c0_12 = arith.constant 0 : index
    %c0_13 = arith.constant 0 : index
    %c0_14 = arith.constant 0 : index
    %31 = vector.load %arg8[%c0_12, %c0_13, %c0_14] : memref<1x1x16xf32, #tpu.memory_space<vmem>>, vector<1x1x16xf32>
    %32 = vector.shape_cast %31 : vector<1x1x16xf32> to vector<1x16xf32>
    %33 = arith.cmpi eq, %4, %6 : i32
    %cst_15 = arith.constant 1.000000e+00 : f32
    %cst_16 = arith.constant 2.000000e+00 : f32
    %34 = arith.select %33, %cst_15, %cst_16 : f32
    %35 = vector.broadcast %30 : vector<16x1xf32> to vector<16x16xf32>
    %36 = arith.mulf %29, %35 : vector<16x16xf32>
    %37 = vector.broadcast %32 : vector<1x16xf32> to vector<16x16xf32>
    %38 = arith.mulf %36, %37 : vector<16x16xf32>
    %39 = vector.shape_cast %38 : vector<16x16xf32> to vector<1x16x16xf32>
    %cst_17 = arith.constant dense<0.000000e+00> : vector<1xf32>
    %40 = vector.multi_reduction <add>, %39, %cst_17 [1, 2] : vector<1x16x16xf32> to vector<1xf32>
    %41 = vector.shape_cast %40 : vector<1xf32> to vector<1x1x1xf32>
    %42 = vector.extract %41[0, 0, 0] : f32 from vector<1x1x1xf32>
    %43 = arith.mulf %34, %42 : f32
    %44 = vector.broadcast %43 : f32 to vector<8x128xf32>
    %c0_18 = arith.constant 0 : index
    %c0_19 = arith.constant 0 : index
    %45 = vector.load %arg10[%c0_18, %c0_19] : memref<8x128xf32, #tpu.memory_space<vmem>>, vector<8x128xf32>
    tpu.vector_store %arg10[%c0_18, %c0_19], %44 {strides = array<i32>} : memref<8x128xf32, #tpu.memory_space<vmem>>, vector<8x128xf32>,
    return
  }
  func.func @transform_0(%arg0: i32, %arg1: memref<3xi32, #tpu.memory_space<smem>>, %arg2: memref<3xi32, #tpu.memory_space<smem>>) -> (i32, i32) {
    %0 = arith.index_cast %arg0 : i32 to index
    %1 = memref.load %arg1[%0] : memref<3xi32, #tpu.memory_space<smem>>
    %c0_i32 = arith.constant 0 : i32
    %c0_i32_0 = arith.constant 0 : i32
    return %1, %c0_i32 : i32, i32
  }
  func.func @transform_1(%arg0: i32, %arg1: memref<3xi32, #tpu.memory_space<smem>>, %arg2: memref<3xi32, #tpu.memory_space<smem>>) -> (i32, i32) {
    %0 = arith.index_cast %arg0 : i32 to index
    %1 = memref.load %arg2[%0] : memref<3xi32, #tpu.memory_space<smem>>
    %c0_i32 = arith.constant 0 : i32
    %c0_i32_0 = arith.constant 0 : i32
    return %1, %c0_i32 : i32, i32
  }
  func.func @transform_2(%arg0: i32, %arg1: memref<3xi32, #tpu.memory_space<smem>>, %arg2: memref<3xi32, #tpu.memory_space<smem>>) -> (i32, i32) {
    %0 = arith.index_cast %arg0 : i32 to index
    %1 = memref.load %arg1[%0] : memref<3xi32, #tpu.memory_space<smem>>
    %c0_i32 = arith.constant 0 : i32
    %c0_i32_0 = arith.constant 0 : i32
    return %1, %c0_i32 : i32, i32
  }
  func.func @transform_3(%arg0: i32, %arg1: memref<3xi32, #tpu.memory_space<smem>>, %arg2: memref<3xi32, #tpu.memory_space<smem>>) -> (i32, i32, i32) {
    %0 = arith.index_cast %arg0 : i32 to index
    %1 = memref.load %arg2[%0] : memref<3xi32, #tpu.memory_space<smem>>
    %c0_i32 = arith.constant 0 : i32
    %c0_i32_0 = arith.constant 0 : i32
    %c0_i32_1 = arith.constant 0 : i32
    return %1, %c0_i32, %c0_i32_0 : i32, i32, i32
  }
  func.func @transform_4(%arg0: i32, %arg1: memref<3xi32, #tpu.memory_space<smem>>, %arg2: memref<3xi32, #tpu.memory_space<smem>>) -> (i32, i32) {
    %0 = arith.index_cast %arg0 : i32 to index
    %1 = memref.load %arg1[%0] : memref<3xi32, #tpu.memory_space<smem>>
    %c0_i32 = arith.constant 0 : i32
    %c0_i32_0 = arith.constant 0 : i32
    return %1, %c0_i32 : i32, i32
  }
  func.func @transform_5(%arg0: i32, %arg1: memref<3xi32, #tpu.memory_space<smem>>, %arg2: memref<3xi32, #tpu.memory_space<smem>>) -> (i32, i32, i32) {
    %0 = arith.index_cast %arg0 : i32 to index
    %1 = memref.load %arg2[%0] : memref<3xi32, #tpu.memory_space<smem>>
    %c0_i32 = arith.constant 0 : i32
    %c0_i32_0 = arith.constant 0 : i32
    %c0_i32_1 = arith.constant 0 : i32
    return %1, %c0_i32, %c0_i32_0 : i32, i32, i32
  }
  func.func @transform_6(%arg0: i32, %arg1: memref<3xi32, #tpu.memory_space<smem>>, %arg2: memref<3xi32, #tpu.memory_space<smem>>) -> i32 {
    %c0_i32 = arith.constant 0 : i32
    %c0_i32_0 = arith.constant 0 : i32
    return %c0_i32 : i32
  }
  func.func @transform_7(%arg0: i32, %arg1: memref<3xi32, #tpu.memory_space<smem>>, %arg2: memref<3xi32, #tpu.memory_space<smem>>) -> (i32, i32) {
    %c0_i32 = arith.constant 0 : i32
    %c0_i32_0 = arith.constant 0 : i32
    return %arg0, %c0_i32 : i32, i32
  }
}

</mosaic_0001>

<bundles_post_ra>
// kernel: tpu_custom_call.1
= control target key start
LH: loop header
LB: loop body
LE: loop exit
PB: predicated region body
PF: predicated region fallthrough
CT: control target
= control target key end

     0   :  { %s1165_s0 = inlined_call_operand.vmem [shape: s32[3], index: 0, kind: input, shape index: {}]   ;;  %s1166_s2 = inlined_call_operand.vmem [shape: f32[32,128], index: 2, kind: input, shape index: {}]   ;;  %s1167_s3 = inlined_call_operand.vmem [shape: f32[32,128], index: 3, kind: input, shape index: {}]   ;;  %s1168_s4 = inlined_call_operand.vmem [shape: f32[32,1], index: 4, kind: input, shape index: {}]   ;;  %s1169_s5 = inlined_call_operand.vmem [shape: f32[2,1,16], index: 5, kind: input, shape index: {}]   ;;  %s1170_s6 = inlined_call_operand.vmem [shape: f32[32,1], index: 6, kind: input, shape index: {}]   ;;  %s1171_s7 = inlined_call_operand.vmem [shape: f32[2,1,16], index: 7, kind: input, shape index: {}]   ;;  %s1172_s8 = inlined_call_operand.vmem [shape: f32[5], index: 8, kind: input, shape index: {}]   ;;  %s1173_s9 = inlined_call_operand.hbm [shape: f32[24,128], index: 9, kind: output, shape index: {}]   ;;  %s1174_s1 = inlined_call_operand.hbm [shape: s32[3], index: 1, kind: input, shape index: {}]  }
   0x1   :  { %1175 = sst [smem:[#allocation12_spill]] %s1172_s8  ;;  %s14_s11 = sshll.u32 %s1165_s0, 4  ;;  %s15_s11 = int_to_ptr.vmem [resolvable:$true] %s14_s11 }
   0x2   :  { %s849_s12 = scalar_lea.vmem %s15_s11, 16  ;;  %p854_p1 = scmp.lt.s32.totalorder %s15_s11, %s15_s11 }
   0x3   :  { %p850_p0 = scmp.ne.s32.totalorder %s15_s11, %s849_s12  ;;  %p855_p2 = scmp.lt.s32.totalorder %s849_s12, %s849_s12 }
   0x5   :  { %p856_p3 = por %p855_p2, %p854_p1 }
   0x7   :  { %p857_p4 = pnand %p856_p3, %p850_p0 }
   0x9   :  { %860 = shalt.err (!%p857_p4)  }
   0xa   :  { %s956_s13 = smov [#allocation3]   ;;  %s861_s16 = scalar_lea.hbm %s1174_s1, 16 }
   0xb   :  { %17 = dma.vmem_to_smem %s15_s11, 16, %s956_s13, [#allocation2] }
   0xc   :  { %p862_p5 = scmp.ne.s32.totalorder %s1174_s1, %s861_s16  ;;  %p865_p6 = scmp.lt.u32.totalorder %s861_s16, %s1174_s1 }
   0xe   :  { %p867_p7 = pnand %p865_p6, %p862_p5 }
  0x10   :  { %870 = shalt.err (!%p867_p7)  }
  0x11   :  { %s957_s20 = smov [#allocation4]  }
  0x12   :  { %19 = dma.hbm_to_smem %s1174_s1, 16, %s957_s20, [#allocation2] }
  0x13   :  { %930 = dma.done.wait [#allocation2], 32 }
  0x14   :  { %931 = vsyncadd [#allocation2], 4294967264 }
  0x15   :  { %21 = sfence }
  0x16   :  { %22 = vsyncpa [#allocation7], 0 }
  0x17   :  { %23 = vsyncpa [#allocation6], 0 }
  0x18   :  { %25 = vsyncpa [#allocation6 + $0x1], 0  ;;  %s1026_s23 = smov 0   ;;  %s1028_s24 = smov 0  }
  0x19   :  { %s1030_s25 = smov 0   ;;  %s1032_s26 = smov 0  }
  0x1a LB: > { %s1047_s1 = sadd.s32 4294967295, %s954_s26   ;;  %s751_s27 = sadd.s32 4294967294, %s954_s26   ;;  %s954_s26 = sphi %s1032_s26, %s1183_s26   ;;  %s950_s25 = sphi %s1030_s25, %s1182_s25   ;;  %s946_s24 = sphi %s1028_s24, %s1181_s24   ;;  %s942_s23 = sphi %s1026_s23, %s1180_s23  }
  0x1b   : > { %s1051_s28 = sadd.s32 1, %s954_s26   ;;  %s227_s29 = sadd.s32 1, %s950_s25 }
  0x1c   : > { %s224_s30 = ssub.s32 %s954_s26, %s1051_s28  ;;  %p237_p8 = scmp.ne.s32.totalorder %s950_s25, %s946_s24 }
  0x1d   : > { %p225_p9 = scmp.eq.s32.totalorder %s224_s30, 0  ;;  %p238_p10 = scmp.eq.s32.totalorder %s1047_s1, 2 }
  0x1e   : > { %p243_p11 = scmp.ne.s32.totalorder %s946_s24, %s942_s23  ;;  %p244_p12 = scmp.eq.s32.totalorder %s751_s27, 2 }
  0x1f   : > { %s1062_s10 = scalar_select %p225_p9, %s950_s25, %s227_s29  }
  0x20   : > { %p1064_p13 = por %p238_p10, %p237_p8  ;;  %p1068_p0 = por %p244_p12, %p243_p11 }
  0x21   : > { %p752_p1 = scmp.ge.s32.totalorder %s954_s26, 1  ;;  %p251_p2 = scmp.lt.s32.totalorder %s954_s26, 4 }
  0x22   : > { %p804_p3 = scmp.eq.s32.totalorder %s1047_s1, 0  ;;  %s1179_s8 = sld [smem:[#allocation12_spill]] }
  0x23   : > { %p1075_p4 = pnand %p752_p1, %p251_p2 }
  0x25   : > { %p796_p5 = pneg %p1075_p4 }
  0x27   : > { %p797_p6 = pnand %p804_p3, %p796_p5 }
  0x28   : > { %s264_s16 = sshll.u32 %s1179_s8, 4  ;;  %s265_s16 = int_to_ptr.vmem [resolvable:$true] %s264_s16 }
  0x29   : > { %s871_s17 = scalar_lea.vmem %s265_s16, 16  ;;  %p873_p8 = pneg %p797_p6 }
  0x2a   : > { %p872_p7 = scmp.ne.s32.totalorder %s265_s16, %s871_s17  ;;  %p879_p11 = scmp.lt.s32.totalorder %s265_s16, %s265_s16 }
  0x2b   : > { %p880_p12 = scmp.lt.s32.totalorder %s871_s17, %s871_s17 }
  0x2c   : > { %p874_p9 = pnand %p873_p8, %p872_p7 }
  0x2d   : > { %p881_p1 = por %p880_p12, %p879_p11 }
  0x2e   : > { %p875_p10 = pneg %p874_p9 }
  0x30   : > { %p882_p2 = pnand %p881_p1, %p875_p10 }
  0x32   : > { %885 = shalt.err (!%p882_p2)
}
  0x33   : > { %s958_s18 = smov [#allocation5]   ;;  %337 = sbr.rel (%p1075_p4) target bundleno = 556 (0x22c), region = 48 }
  0x34   : > { %799 = dma.vmem_to_smem (!%p797_p6), %s265_s16, 16, %s958_s18, [#allocation7]  }
  0x3a   : > { %933 = dma.done.wait (%p804_p3), [#allocation7], 16  }
  0x3b   : > { %935 = vsyncadd (%p804_p3), [#allocation7], 4294967280 }
  0x3c   : > { %343 = sfence }
  0x3d   : > { %s405_s19 = sld [smem:[#allocation4 + %s1047_s1]]  ;;  %v959_v0 = vmov 0   ;;  %vm596_vm0 = vcmask 130048  }
  0x3e   : > { %s397_s0 = sld [smem:[#allocation3 + %s1047_s1]]  ;;  %843 = vset.pattern.permute.xlu0 %v959_v0  ;;  %844 = vset.pattern.permute.xlu1 %v959_v0 }
  0x3f   : > { %s413_s20 = sld [smem:[#allocation3 + %s1047_s1]] }
  0x40   : > { %s426_s21 = sld [smem:[#allocation3 + %s1047_s1]] }
  0x41   : > { %s434_s18 = sld [smem:[#allocation4 + %s1047_s1]] }
  0x43   : > { %s760_s22 = sshll.u32 %s405_s19, 1 }
  0x44   : > { %s758_s27 = sshll.u32 %s397_s0, 1  ;;  %p407_p4 = scmp.lt.s32.totalorder %s760_s22, 3 }
  0x45   : > { %p399_p5 = scmp.lt.s32.totalorder %s758_s27, 3  ;;  %s762_s29 = sshll.u32 %s413_s20, 1 }
  0x46   : > { %s764_s30 = sshll.u32 %s426_s21, 1  ;;  %s1185_s22 = smov (!%p407_p4, %s760_s22), 3 }
  0x47   : > { %s1187_s27 = smov (!%p399_p5, %s758_s27), 3  ;;  %s761_s13 = sshll.u32 %s1185_s22, 3 }
  0x48   : > { %p415_p3 = scmp.lt.s32.totalorder %s762_s29, 3  ;;  %s410_s16 = scalar_lea.vmem %s1167_s3, %s761_s13 }
  0x49   : > { %s759_s17 = sshll.u32 %s1187_s27, 3  ;;  %v441_v1 = vld [vmem:[%s410_s16] sm:$0xff]  ;;  %v442_v2 = vld [vmem:[%s410_s16 + $0x8] sm:$0xff]  ;;  %p428_p6 = scmp.lt.s32.totalorder %s764_s30, 3 }
  0x4a   : > { %s402_s19 = scalar_lea.vmem %s1166_s2, %s759_s17  ;;  %v784_v3 = vpack.c.bf16 %v442_v2, %v441_v1  ;;  %s1189_s29 = smov (!%p415_p3, %s762_s29), 3 }
  0x4b   : > { %v439_v4 = vld [vmem:[%s402_s19] sm:$0xff]  ;;  %s1191_s30 = smov (!%p428_p6, %s764_s30), 3  ;;  %s763_s0 = sshll.u32 %s1189_s29, 3  ;;  %v440_v8 = vld [vmem:[%s402_s19 + $0x8] sm:$0xff] }
  0x4c   : > { %781 = vmatprep.mubr.f32.mxu0 %v439_v4  ;;  %785 = vmatprep.subr.bf16.mxu0 %v784_v3  ;;  %s418_s22 = scalar_lea.vmem %s1168_s4, %s763_s0  ;;  %s765_s27 = sshll.u32 %s1191_s30, 3 }
  0x4d   : > { %787 = vmatpush3.bf16.xpose.msra.mxu0 %v784_v3  ;;  %v520_v5 = vld [vmem:[%s418_s22] sm:$0xff]  ;;  %s431_s8 = scalar_lea.vmem %s1170_s6, %s765_s27  ;;  %v521_v7 = vld [vmem:[%s418_s22 + $0x8] sm:$0xff]  ;;  %s421_s29 = sld [smem:[#allocation4 + %s1047_s1]] }
  0x4e   : > { %525 = vperm.xlu0 %843, %v520_v5   ;;  %v571_v6 = vld [vmem:[%s431_s8] sm:$0xff]  ;;  %v572_v9 = vld [vmem:[%s431_s8 + $0x8] sm:$0xff]  ;;  %s767_s17 = sld [smem:[#allocation5 + $0x4]]  ;;  %p435_p8 = scmp.lt.s32.totalorder %s434_s18, 1 }
  0x4f   : > { %578 = vperm.xlu1 %844, %v571_v6   ;;  %s518_s21 = sld [smem:[#allocation3 + %s1047_s1]]  ;;  %s394_s27 = sand.u32 1, %s946_s24  }
  0x50   : > { %s1195_s18 = smov (!%p435_p8, %s434_s18), 1  ;;  %s519_s22 = sld [smem:[#allocation4 + %s1047_s1]] }
  0x51   : > { %s437_s20 = scalar_lea.vmem %s1171_s7, %s1195_s18  ;;  %s757_s13 = sshll.u32 %s394_s27, 3 }
  0x52   : > { %530 = vperm.xlu0 %843, %v521_v7   ;;  %v768_v46 = vld [vmem:[%s437_s20] ss:$0 sm:$0xff]  ;;  %s770_s8 = sshll.u32 %s1047_s1, 7  ;;  %s613_s0 = scalar_lea.sflag [#allocation6], %s394_s27 }
  0x53   : > { %583 = vperm.xlu1 %844, %v572_v9   ;;  %p422_p7 = scmp.lt.s32.totalorder %s421_s29, 1  ;;  %s1123_s19 = scalar_lea.hbm %s1173_s9, %s770_s8 }
  0x54   : > { %782 = vmatmul.mubr.f32.vlgmr.msra.gmra.mrb[0].mxu0 %v440_v8  ;;  %v548_v20 = vstv %s767_s17  ;;  %s960_s1 = smov [#allocation8]  }
  0x55   : > { %s1193_s29 = smov (!%p422_p7, %s421_s29), 1 }
  0x56   : > { %s424_s16 = scalar_lea.vmem %s1169_s5, %s1193_s29  ;;  %p574_p9 = scmp.eq.s32.totalorder %s518_s21, %s519_s22 }
  0x57   : > { %v766_v11 = vld [vmem:[%s424_s16] ss:$0 sm:$0xff]  ;;  %s396_s29 = scalar_lea.vmem [#allocation8], %s757_s13  ;;  %s890_s21 = sshll.u32 %s960_s1, 4  ;;  %s891_s21 = int_to_ptr.vmem [resolvable:$false] %s890_s21 }
  0x58   : > { %s575_s14 = scalar_select %p574_p9, 1.0, 2.0 }
  0x59   : > { %s626_s15 = sshll.u32 %s396_s29, 4  ;;  %s892_s22 = scalar_lea.vmem %s891_s21, 256  ;;  %s1125_s15 = int_to_ptr.vmem [resolvable:$true] %s626_s15 }
  0x5a   : > { %s886_s20 = scalar_lea.vmem %s1125_s15, 128  ;;  %p893_p1 = scmp.lt.s32.totalorder %s1125_s15, %s891_s21 }
  0x5b   : > { %p887_p10 = scmp.ne.s32.totalorder %s1125_s15, %s886_s20  ;;  %p894_p2 = scmp.lt.s32.totalorder %s892_s22, %s886_s20 }
  0x5d   : > { %p888_p11 = pnand %p887_p10, %p1064_p13  ;;  %p895_p4 = por %p894_p2, %p893_p1 }
  0x5f   : > { %p889_p12 = pneg %p888_p11 }
  0x61   : > { %p896_p5 = pnand %p895_p4, %p889_p12 }
  0xcd   : > { %v526_v10 = vpop.permute.xlu0 %525 }
  0xce   : > { %v539_v17 = vadd.f32 %v766_v11, %v526_v10  ;;  %v579_v34 = vpop.permute.xlu1 %578 }
  0xd1   : > { %v531_v12 = vpop.permute.xlu0 %530 }
  0xd2   : > { %v540_v14 = vadd.f32 %v766_v11, %v531_v12  ;;  %v584_v48 = vpop.permute.xlu1 %583 }
 0x127   : > { %v783_v13 = vpop.f32.mrb[0].mxu0 }
 0x128   : > { %v542_v15 = vmul.f32 2.0, %v783_v13  ;;  %v509_v16 = vpop.f32.mrb[1].mxu0 }
 0x129   : > { %v541_v18 = vmul.f32 2.0, %v509_v16 }
 0x12a   : > { %v544_v19 = vsub.f32 %v540_v14, %v542_v15 }
 0x12b   : > { %v543_v21 = vsub.f32 %v539_v17, %v541_v18 }
 0x12c   : > { %v546_v22 = vmax.f32 %v544_v19, 0.0 }
 0x12d   : > { %v545_v23 = vmax.f32 %v543_v21, 0.0 }
 0x12e   : > { %v550_v24 = vmul.f32 %v548_v20, %v546_v22 }
 0x12f   : > { %v549_v25 = vmul.f32 %v548_v20, %v545_v23 }
 0x130   : > { %v553_v26 = vmul.f32 1.442695, %v550_v24 }
 0x131   : > { %v551_v27 = vmul.f32 1.442695, %v549_v25 }
 0x132   : > { %845 = vpow2.f32 %v553_v26 }
 0x133   : > { %847 = vpow2.f32 %v551_v27 }
 0x13c   : > { %v846_v28 = vpop.eup %845 }
 0x13d   : > { %v848_v29 = vpop.eup %847  ;;  %v556_v30 = vmul.f32 %v846_v28, %v846_v28 }
 0x13e   : > { %v555_v31 = vmul.f32 %v848_v29, %v848_v29 }
 0x13f   : > { %v558_v32 = vadd.f32 %v846_v28, %v556_v30  ;;  %v560_v33 = vmul.f32 %v556_v30, %v556_v30 }
 0x140   : > { %v557_v35 = vadd.f32 %v848_v29, %v555_v31  ;;  %v559_v36 = vmul.f32 %v555_v31, %v555_v31 }
 0x141   : > { %v562_v37 = vadd.f32 %v560_v33, %v558_v32  ;;  %v564_v38 = vmul.f32 %v560_v33, %v560_v33 }
 0x142   : > { %v561_v39 = vadd.f32 %v559_v36, %v557_v35  ;;  %v563_v40 = vmul.f32 %v559_v36, %v559_v36 }
 0x143   : > { %v566_v41 = vadd.f32 %v564_v38, %v562_v37  ;;  %v568_v42 = vmul.f32 %v564_v38, %v564_v38 }
 0x144   : > { %v565_v43 = vadd.f32 %v563_v40, %v561_v39  ;;  %v567_v44 = vmul.f32 %v563_v40, %v563_v40 }
 0x145   : > { %v570_v45 = vadd.f32 %v568_v42, %v566_v41 }
 0x146   : > { %v569_v47 = vadd.f32 %v567_v44, %v565_v43 }
 0x147   : > { %v587_v49 = vmul.f32 %v584_v48, %v570_v45 }
 0x148   : > { %v586_v50 = vmul.f32 %v579_v34, %v569_v47 }
 0x149   : > { %v595_v51 = vmul.f32 %v768_v46, %v587_v49 }
 0x14a   : > { %v594_v52 = vmul.f32 %v768_v46, %v586_v50 }
 0x14b   : > { %v598_v53 = vsel %vm596_vm0, %v595_v51, 0.0 }
 0x14c   : > { %v597_v54 = vsel %vm596_vm0, %v594_v52, 0.0 }
 0x14d   : > { %v599_v55 = vadd.f32 %v598_v53, %v597_v54 }
 0x14f   : > { %600 = vadd.xlane.f32.xlu0 %v599_v55 }
 0x1dc   : > { %v601_v56 = vpop.xlane.xlu0 %600 }
 0x1dd   : > { %v602_v57 = vrot.slane %v601_v56, 4 }
 0x1df   : > { %v603_v58 = vadd.f32 %v602_v57, %v601_v56 }
 0x1e1   : > { %v604_v59 = vrot.slane %v603_v58, 2 }
 0x1e3   : > { %v605_v60 = vadd.f32 %v604_v59, %v603_v58 }
 0x1e5   : > { %v606_v61 = vrot.slane %v605_v60, 1 }
 0x1e7   : > { %v607_v62 = vadd.f32 %v606_v61, %v605_v60 }
 0x1e9   : > { %788 = vpush %v607_v62 }
 0x21a   : > { %s789_s30 = spop %788 }
 0x21b   : > { %s609_s16 = smul.f32 %s789_s30, %s575_s14 }
 0x21d   : > { %v610_v63 = vstv %s609_s16 }
 0x21e   : > { %611 = vst [vmem:[%s396_s29] sm:$0xff] %v610_v63 }
 0x21f   : > { %899 = shalt.err (!%p896_p5)
}
 0x220   : > { %s900_s27 = scalar_lea.hbm %s1123_s19, 128  ;;  %s904_s8 = scalar_lea.hbm %s1173_s9, 384 }
 0x221   : > { %p901_p3 = scmp.ne.s32.totalorder %s1123_s19, %s900_s27  ;;  %p905_p8 = scmp.lt.u32.totalorder %s1123_s19, %s1173_s9 }
 0x222   : > { %p906_p9 = scmp.lt.u32.totalorder %s904_s8, %s900_s27  ;;  %p908_p11 = scmp.lt.u32.totalorder %s900_s27, %s1123_s19 }
 0x223   : > { %p902_p6 = pnand %p901_p3, %p1064_p13 }
 0x224   : > { %p907_p10 = por %p906_p9, %p905_p8 }
 0x225   : > { %p903_p7 = pneg %p902_p6 }
 0x226   : > { %p909_p12 = por %p908_p11, %p907_p10 }
 0x228   : > { %p910_p1 = pnand %p909_p12, %p903_p7 }
 0x22a   : > { %913 = shalt.err (!%p910_p1)
}
 0x22b   : > { %794 = dma.vmem_to_hbm [thread:$0]  (%p1064_p13), %s1125_s15, 128, %s1123_s19, %s613_s0  }
 0x22c PF: > { %p806_p2 = scmp.ge.s32.totalorder %s954_s26, 2  ;;  %s638_s16 = sand.u32 1, %s942_s23  }
 0x22d   : > { %s639_s17 = scalar_lea.sflag [#allocation6], %s638_s16 }
 0x22e   : > { %p801_p4 = pnand %p806_p2, %p1068_p0 }
 0x230   : > { %937 = dma.done.wait (!%p801_p4), %s639_s17, 128  }
 0x231   : > { %939 = vsyncadd (!%p801_p4), %s639_s17, 4294967168  ;;  %p28_p5 = scmp.ge.s32.totalorder %s1051_s28, 5   ;;  %s1180_s23 = smov %s946_s24 }
 0x232   : > { %s1181_s24 = smov %s950_s25  ;;  %s1182_s25 = smov %s1062_s10 }
 0x233   : > { %s1183_s26 = smov %s1051_s28  ;;  %30 = sbr.rel (!%p28_p5) target bundleno = 26 (0x1a), region = 103 }
 0x23a   :  { %644 = vsyncpa [#allocation6], 1 }
 0x23b   :  { %646 = vsyncpa [#allocation6 + $0x1], 1 }
 0x23c   :  { %647 = vsyncpa [#allocation7], 1 }
 0x23d   :  { %649 = vsyncpa [#allocation7 + $0x1], 1 }

</bundles_post_ra>
